<compile_context>
chip_gen: v6e
topology: v6e:2x2x1
jax: 0.10.0
libtpu: 0.0.40
codegen_flags: <defaults>
</compile_context>

<pallas_src>
import functools

import jax
import jax.numpy as jnp
from jax.experimental import pallas as pl
from jax.experimental.pallas import tpu as pltpu


def _meanpool_kernel(enc_ref, out_ref, acc_ref, *, inv_s, s_total, t_s,
                     ragged, acc_rows):
    """Mean over S, tiled. grid = (lane-chunk [parallel], S-block [arbitrary]).

    enc_ref: (t_s, BHc)       tile of the (S, B*H) slab
    out_ref: (1, BHc)         mean, written on the last reduction step
    acc_ref: (acc_rows, BHc)  f32 scratch, persistent across the S axis
    """
    k = pl.program_id(1)                      # reduction (S) axis, last in grid
    last = pl.num_programs(1) - 1

    @pl.when(k == 0)
    def _init():
        acc_ref[...] = jnp.zeros_like(acc_ref)

    x = enc_ref[...].astype(jnp.float32)      # (t_s, BHc)

    if ragged:
        # S % t_s != 0: the last tile's trailing rows read past the array end
        # (undefined contents). Zero them BEFORE accumulating. On full tiles
        # valid == t_s so the where is a no-op (hides under the HBM DMA).
        valid = jnp.minimum(s_total - k * t_s, t_s)
        row_ids = jax.lax.broadcasted_iota(jnp.int32, x.shape, 0)
        x = jnp.where(row_ids < valid, x, 0.0)

    if acc_rows > 1:
        # Fold t_s rows into the 8-sublane-wide accumulator with pure vreg
        # adds -- no cross-sublane (XLU) reduce inside the loop.
        acc_ref[...] += jnp.sum(
            x.reshape(t_s // acc_rows, acc_rows, x.shape[-1]), axis=0)
    else:
        acc_ref[...] += jnp.sum(x, axis=0, keepdims=True)

    @pl.when(k == last)
    def _finalize():
        total = jnp.sum(acc_ref[...], axis=0, keepdims=True)  # one XLU reduce
        out_ref[...] = (total * inv_s).astype(out_ref.dtype)


def mean_pool(hidden, encoder_outputs, *, force_pallas=False,
              tile_budget_bytes=12 * 1024 * 1024):
    """hidden: (B, H), encoder_outputs: (S, B, H) -> (output (B, H), alpha (B, S))."""
    B, H = hidden.shape
    S = encoder_outputs.shape[0]
    dtype = encoder_outputs.dtype
    BH = B * H
    itemsize = jnp.dtype(dtype).itemsize

    # alpha = softmax over dim 0 (batch dim) of ones(B, S) == constant 1/B.
    # Pure compile-time constant; no kernel work.
    alpha = jnp.full((B, S), 1.0 / B, dtype=jnp.float32)

    # Tiny problems: a fused XLA reduce beats kernel-launch + per-step overhead.
    if not force_pallas and S * BH * itemsize < (1 << 20):
        return jnp.mean(encoder_outputs, axis=0), alpha

    # Lane-dense 2-D view: trailing dim B*H maps onto the 128-lane axis.
    enc2d = encoder_outputs.reshape(S, BH)

    # --- Megacore: shard the independent lane axis when it splits cleanly. ---
    num_bh_chunks = 1
    for n in (4, 2):
        if BH >= n * 128 and BH % (n * 128) == 0:
            num_bh_chunks = n
            break
    BHc = BH // num_bh_chunks

    # --- S-tile: biggest multiple-of-32 row count under the per-buffer budget.
    bytes_per_row = max(BHc * itemsize, 1)
    rows_budget = max(int(tile_budget_bytes) // bytes_per_row, 1)
    if rows_budget >= S:
        tS = S                                   # full extent: always legal
    else:
        tS = max(32, (rows_budget // 32) * 32)   # 32 is safe for every dtype
    num_blocks = -(-S // tS)
    ragged = (num_blocks * tS != S)              # last tile reads OOB -> mask
    acc_rows = 8 if tS % 8 == 0 else 1

    # Explicit VMEM limit: double-buffered input tile + output + accumulator
    # (+ margin). Makes the tile budget independent of per-generation scoped
    # VMEM defaults while staying well under v7x's 64 MiB physical per-TC.
    tile_bytes = tS * BHc * itemsize
    vmem_limit = (2 * tile_bytes + 2 * BHc * itemsize
                  + acc_rows * BHc * 4 + (2 << 20))
    vmem_limit = int(min(max(vmem_limit, 8 << 20), 48 << 20))

    cost = pl.CostEstimate(
        flops=int(S) * int(BH),
        transcendentals=0,
        bytes_accessed=int(S) * int(BH) * itemsize + int(BH) * itemsize,
    )

    out2d = pl.pallas_call(
        functools.partial(
            _meanpool_kernel, inv_s=1.0 / S, s_total=S, t_s=tS,
            ragged=ragged, acc_rows=acc_rows),
        out_shape=jax.ShapeDtypeStruct((1, BH), dtype),
        grid=(num_bh_chunks, num_blocks),            # reduction axis last
        in_specs=[pl.BlockSpec((tS, BHc), lambda j, k: (k, j))],
        out_specs=pl.BlockSpec((1, BHc), lambda j, k: (0, j)),
        scratch_shapes=[pltpu.VMEM((acc_rows, BHc), jnp.float32)],
        compiler_params=pltpu.CompilerParams(
            dimension_semantics=("parallel", "arbitrary"),
            vmem_limit_bytes=vmem_limit,
        ),
        cost_estimate=cost,
    )(enc2d)

    return out2d.reshape(B, H), alpha


if __name__ == "__main__":
    key = jax.random.PRNGKey(0)
    k1, k2, k3 = jax.random.split(key, 3)

    B, S, H = 2, 8, 32  # batch, src sequence length, hidden size
    hidden = jax.random.normal(k1, (B, H), dtype=jnp.float32)
    encoder_outputs = jax.random.normal(k2, (S, B, H), dtype=jnp.float32)

    # force_pallas=True so the test exercises the kernel even at this tiny size
    # (the wrapper would otherwise dispatch to plain XLA, which is faster here).
    output, alpha = mean_pool(hidden, encoder_outputs, force_pallas=True)
    jax.block_until_ready((output, alpha))

    ref_out = jnp.mean(encoder_outputs, axis=0)
    ref_alpha = jax.nn.softmax(jnp.ones((B, S), jnp.float32), axis=0)
    assert output.shape == (B, H) and alpha.shape == (B, S)
    assert jnp.allclose(output, ref_out, atol=1e-5, rtol=1e-5)
    assert jnp.allclose(alpha, ref_alpha, atol=1e-6, rtol=1e-6)

    # Second check: ragged S with a multi-step reduction (forces a tiny tile so
    # the in-kernel iota mask + accumulator path is exercised: S=50, tS=32).
    S2 = 50
    enc2 = jax.random.normal(k3, (S2, B, H), dtype=jnp.float32)
    out2, alpha2 = mean_pool(hidden, enc2, force_pallas=True,
                             tile_budget_bytes=32 * B * H * 4)
    jax.block_until_ready((out2, alpha2))
    assert jnp.allclose(out2, jnp.mean(enc2, axis=0), atol=1e-5, rtol=1e-5)
    assert alpha2.shape == (B, S2)

    print("KERNEL_OK")
</pallas_src>

<mosaic_0001>
module attributes {stable_mosaic.version = 11 : i64} {
  func.func @_meanpool_kernel(%arg0: i32, %arg1: i32, %arg2: memref<8x64xf32, #tpu.memory_space<vmem>>, %arg3: memref<1x64xf32, #tpu.memory_space<vmem>>, %arg4: memref<8x64xf32, #tpu.memory_space<vmem>>) attributes {dimension_semantics = [#tpu.dimension_semantics<parallel>, #tpu.dimension_semantics<arbitrary>], iteration_bounds = array<i64: 1, 1>, scalar_prefetch = 0 : i64, scratch_operands = 1 : i64, tpu.core_type = #tpu.core_type<tc>, window_params = [{transform_indices = @transform_0, window_bounds = array<i64: 8, 64>}, {transform_indices = @transform_1, window_bounds = array<i64: 1, 64>}]} {
    %c0_i32 = arith.constant 0 : i32
    %0 = arith.cmpi eq, %arg1, %c0_i32 : i32
    %1 = arith.extui %0 : i1 to i32
    %c0_i32_0 = arith.constant 0 : i32
    %2 = arith.cmpi ne, %1, %c0_i32_0 : i32
    scf.if %2 {
      %cst_8 = arith.constant 0.000000e+00 : f32
      %12 = vector.broadcast %cst_8 : f32 to vector<8x64xf32>
      %c0_9 = arith.constant 0 : index
      %c0_10 = arith.constant 0 : index
      %13 = vector.load %arg4[%c0_9, %c0_10] : memref<8x64xf32, #tpu.memory_space<vmem>>, vector<8x64xf32>
      tpu.vector_store %arg4[%c0_9, %c0_10], %12 {strides = array<i32>} : memref<8x64xf32, #tpu.memory_space<vmem>>, vector<8x64xf32>,
    } else {
    }
    %c0 = arith.constant 0 : index
    %c0_1 = arith.constant 0 : index
    %3 = vector.load %arg2[%c0, %c0_1] : memref<8x64xf32, #tpu.memory_space<vmem>>, vector<8x64xf32>
    %c0_2 = arith.constant 0 : index
    %c0_3 = arith.constant 0 : index
    %4 = vector.load %arg4[%c0_2, %c0_3] : memref<8x64xf32, #tpu.memory_space<vmem>>, vector<8x64xf32>
    %5 = vector.shape_cast %3 : vector<8x64xf32> to vector<1x8x64xf32>
    %cst = arith.constant dense<0.000000e+00> : vector<8x64xf32>
    %6 = vector.multi_reduction <add>, %5, %cst [0] : vector<1x8x64xf32> to vector<8x64xf32>
    %7 = arith.addf %4, %6 : vector<8x64xf32>
    %c0_4 = arith.constant 0 : index
    %c0_5 = arith.constant 0 : index
    %8 = vector.load %arg4[%c0_4, %c0_5] : memref<8x64xf32, #tpu.memory_space<vmem>>, vector<8x64xf32>
    tpu.vector_store %arg4[%c0_4, %c0_5], %7 {strides = array<i32>} : memref<8x64xf32, #tpu.memory_space<vmem>>, vector<8x64xf32>,
    %c0_i32_6 = arith.constant 0 : i32
    %9 = arith.cmpi eq, %arg1, %c0_i32_6 : i32
    %10 = arith.extui %9 : i1 to i32
    %c0_i32_7 = arith.constant 0 : i32
    %11 = arith.cmpi ne, %10, %c0_i32_7 : i32
    scf.if %11 {
      %c0_8 = arith.constant 0 : index
      %c0_9 = arith.constant 0 : index
      %12 = vector.load %arg4[%c0_8, %c0_9] : memref<8x64xf32, #tpu.memory_space<vmem>>, vector<8x64xf32>
      %cst_10 = arith.constant dense<0.000000e+00> : vector<64xf32>
      %13 = vector.multi_reduction <add>, %12, %cst_10 [0] : vector<8x64xf32> to vector<64xf32>
      %14 = vector.shape_cast %13 : vector<64xf32> to vector<1x64xf32>
      %cst_11 = arith.constant 1.250000e-01 : f32
      %15 = vector.broadcast %cst_11 : f32 to vector<1x64xf32>
      %16 = arith.mulf %14, %15 : vector<1x64xf32>
      %c0_12 = arith.constant 0 : index
      %c0_13 = arith.constant 0 : index
      %17 = vector.load %arg3[%c0_12, %c0_13] : memref<1x64xf32, #tpu.memory_space<vmem>>, vector<1x64xf32>
      tpu.vector_store %arg3[%c0_12, %c0_13], %16 {strides = array<i32>} : memref<1x64xf32, #tpu.memory_space<vmem>>, vector<1x64xf32>,
    } else {
    }
    return
  }
  func.func @transform_0(%arg0: i32, %arg1: i32) -> (i32, i32) {
    %c0_i32 = arith.constant 0 : i32
    return %arg1, %arg0 : i32, i32
  }
  func.func @transform_1(%arg0: i32, %arg1: i32) -> (i32, i32) {
    %c0_i32 = arith.constant 0 : i32
    %c0_i32_0 = arith.constant 0 : i32
    return %c0_i32, %arg0 : i32, i32
  }
}

</mosaic_0001>

<bundles_post_ra>
// kernel: tpu_custom_call.1
= control target key start
LH: loop header
LB: loop body
LE: loop exit
PB: predicated region body
PF: predicated region fallthrough
CT: control target
= control target key end

     0   :  { %6 = vsyncpa [#allocation4], 0  ;;  %s128_s0 = inlined_call_operand.hbm [shape: f32[8,64], index: 0, kind: input, shape index: {}]   ;;  %s129_s1 = inlined_call_operand.hbm [shape: f32[1,64], index: 1, kind: output, shape index: {}]  }
   0x1   :  { %7 = vsyncpa [#allocation5], 0  ;;  %s109_s6 = smov [#allocation3]  }
   0x2   :  { %s14_s7 = sshll.u32 %s109_s6, 4  ;;  %s15_s7 = int_to_ptr.vmem [resolvable:$true] %s14_s7 }
   0x3   :  { %s73_s8 = scalar_lea.vmem %s15_s7, 128  ;;  %p78_p1 = scmp.lt.s32.totalorder %s15_s7, %s15_s7 }
   0x4   :  { %p74_p0 = scmp.ne.s32.totalorder %s15_s7, %s73_s8  ;;  %p79_p2 = scmp.lt.s32.totalorder %s73_s8, %s73_s8 }
   0x6   :  { %p80_p3 = por %p79_p2, %p78_p1 }
   0x8   :  { %p81_p4 = pnand %p80_p3, %p74_p0 }
   0xa   :  { %84 = shalt.err (!%p81_p4)
}
   0xb   :  { %17 = dma.hbm_to_vmem [thread:$0]  %s128_s0, 128, %s15_s7, [#allocation4]  }
   0xc   :  { %105 = dma.done.wait [#allocation4], 128  }
   0xd   :  { %106 = vsyncadd [#allocation4], 4294967168  ;;  %vm25_vm0 = vcmask 523264   ;;  %v110_v0 = vmov 0.0   ;;  %v27_v1 = vld [vmem:[#allocation3] sm:$0xff]  ;;  %s111_s11 = smov [#allocation6]  }
   0xe   :  { %26 = vst.msk [vmem:[#allocation2] sm:$0xff] %vm25_vm0, %v110_v0  ;;  %s53_s12 = sshll.u32 %s111_s11, 4  ;;  %vm45_vm1 = vcmask 516096   ;;  %s54_s12 = int_to_ptr.vmem [resolvable:$true] %s53_s12 }
   0xf   :  { %s85_s0 = scalar_lea.vmem %s54_s12, 16  ;;  %s89_s13 = scalar_lea.vmem %s54_s12, 32 }
  0x10   :  { %p86_p5 = scmp.ne.s32.totalorder %s54_s12, %s85_s0  ;;  %p90_p6 = scmp.lt.s32.totalorder %s54_s12, %s54_s12 }
  0x11   :  { %p91_p7 = scmp.lt.s32.totalorder %s89_s13, %s85_s0 }
  0x13   :  { %p92_p8 = por %p91_p7, %p90_p6 }
  0x15   :  { %v28_v2 = vld [vmem:[#allocation2] sm:$0xff]  ;;  %p93_p9 = pnand %p92_p8, %p86_p5 }
  0x16   :  { %v30_v3 = vadd.f32 %v28_v2, %v27_v1 }
  0x18   :  { %32 = vst.msk [vmem:[#allocation2] sm:$0xff] %vm25_vm0, %v30_v3 }
  0x1f   :  { %v36_v4 = vld [vmem:[#allocation2] sm:$0xff] }
  0x20   :  { %v37_v5 = vsel %vm25_vm0, %v36_v4, 0.0 }
  0x21   :  { %v38_v6 = vrot.slane %v37_v5, 4 }
  0x23   :  { %v39_v7 = vadd.f32 %v38_v6, %v37_v5 }
  0x25   :  { %v40_v8 = vrot.slane %v39_v7, 2 }
  0x27   :  { %v41_v9 = vadd.f32 %v40_v8, %v39_v7 }
  0x29   :  { %v42_v10 = vrot.slane %v41_v9, 1 }
  0x2b   :  { %v43_v11 = vadd.f32 %v42_v10, %v41_v9 }
  0x2d   :  { %v44_v12 = vmul.f32 0.125, %v43_v11 }
  0x2f   :  { %46 = vst.msk [vmem:[#allocation6] sm:$0x1] %vm45_vm1, %v44_v12 }
  0x30   :  { %96 = shalt.err (!%p93_p9)
}
  0x31   :  { %56 = dma.vmem_to_hbm [thread:$0]  %s54_s12, 16, %s129_s1, [#allocation5]  }
  0x32   :  { %107 = dma.done.wait [#allocation5], 16  }
  0x33   :  { %108 = vsyncadd [#allocation5], 4294967280 }
  0x34   :  { %60 = vsyncpa [#allocation4], 1 }
  0x35   :  { %61 = vsyncpa [#allocation5], 1 }

</bundles_post_ra>
